<compile_context>
chip_gen: v5e
topology: v5e:2x2
jax: 0.10.0
libtpu: 0.0.40
codegen_flags: <defaults>
</compile_context>

<pallas_src>
import functools

import jax
import jax.numpy as jnp
from jax.experimental import pallas as pl
from jax.experimental.pallas import tpu as pltpu


def _segment_matrices(num_heads, head_dim, dtype):
    """Constant 0/1 selectors for per-head ops on the flat H*K lane layout.

    seg_mat   : (H*K, H)  -- (q*k) @ seg_mat sums each head's K lanes (scores).
    expand_mat: (H, H*K)  -- p @ expand_mat repeats each head's prob across its
                 K lanes.  Built once in the wrapper and passed as resident inputs.
    """
    H, K = num_heads, head_dim
    HK = H * K
    head_of_lane = jnp.arange(HK, dtype=jnp.int32) // K                     # (HK,)
    heads = jnp.arange(H, dtype=jnp.int32)
    seg_mat = (head_of_lane[:, None] == heads[None, :]).astype(dtype)       # (HK, H)
    expand_mat = (heads[:, None] == head_of_lane[None, :]).astype(dtype)    # (H, HK)
    return seg_mat, expand_mat


def _default_vmem_limit():
    # v5e/v6e: 128 MiB physical -> ~96 MiB scoped; v7x: 64 MiB -> ~48 MiB.
    try:
        cap = pltpu.get_tpu_info().vmem_capacity_bytes
    except Exception:  # unknown generation / query unavailable
        cap = 64 * 1024 * 1024
    return int(min(cap * 3 // 4, 100 * 1024 * 1024))


def _mla_attn_kernel(hq_ref, kv_ref, wq_ref, bq_ref, wkv_ref, seg_ref, exp_ref,
                     o_ref, *, num_heads, head_dim, compute_dtype):
    H, K = num_heads, head_dim
    HK = H * K
    TB, L, C = kv_ref.shape
    cd = compute_dtype
    low_precision = cd != jnp.float32

    # ---- q projection: (TB, D) @ (D, HK) on the MXU, f32 accumulate + f32 bias --
    q = jnp.dot(hq_ref[...], wq_ref[...],
                preferred_element_type=jnp.float32) + bq_ref[...]           # (TB, HK)

    # ---- fused k/v projection: one (TB*L, C) @ (C, 2*HK) matmul -----------------
    # Fills the 256-wide MXU output dim on v6e/v7x; k / v are 128-lane-aligned
    # slices of the f32 accumulator (no relayout).
    kv = kv_ref[...].reshape(TB * L, C)                                     # (TB*L, C)
    kvp = jnp.dot(kv, wkv_ref[...], preferred_element_type=jnp.float32)     # (TB*L, 2HK)
    k = kvp[:, :HK]
    v = kvp[:, HK:]

    # ---- per-head score contraction on the flat HK layout -----------------------
    # Implicit L-broadcast of q (no materialized broadcast_to buffer), then the
    # block-diagonal selector matmul (bf16 operands, f32 accumulate) sums each
    # head's K lanes.  No (H, K) reshapes / relayouts of q or k.
    qk = (q[:, None, :] * k.reshape(TB, L, HK)).reshape(TB * L, HK)
    scores = jnp.dot(qk.astype(cd), seg_ref[...],
                     preferred_element_type=jnp.float32)                    # (TB*L, H)

    # ---- softmax over L in f32 (NO 1/sqrt(K) scaling, matching the module) ------
    s3 = scores.reshape(TB, L, H)
    m = jnp.max(s3, axis=1, keepdims=True)                                  # (TB, 1, H)
    p = jnp.exp(s3 - m)                                                     # (TB, L, H)
    denom = jnp.sum(p, axis=1)                                              # (TB, H)
    inv = pl.reciprocal(denom, approx=low_precision)                        # EUP when bf16
    p = p * inv[:, None, :]                                                 # normalized probs

    # ---- expand probs H -> HK lanes (single selector matmul), weight v, sum L ---
    p_lanes = jnp.dot(p.reshape(TB * L, H).astype(cd), exp_ref[...],
                      preferred_element_type=jnp.float32)                   # (TB*L, HK)
    out = jnp.sum((p_lanes * v).reshape(TB, L, HK), axis=1)                 # (TB, HK)

    o_ref[...] = out.astype(o_ref.dtype)                                    # lane-dense store


def simple_compressed_attention(hidden_states_q, compressed_kv, w_q, b_q, w_k, w_v,
                                *, num_heads, head_dim, batch_tile=128,
                                compute_dtype=jnp.bfloat16):
    """JAX/Pallas equivalent of SimpleCompressedAttention.forward.

    hidden_states_q: [B, D]; compressed_kv: [B, L, C];
    w_q: [D, H*K]; b_q: [H*K]; w_k, w_v: [C, H*K] (torch weights transposed).
    Returns [B, H*K] in hidden_states_q.dtype.
    """
    B, D = hidden_states_q.shape
    _, L, C = compressed_kv.shape
    HK = num_heads * head_dim
    assert w_q.shape == (D, HK) and b_q.shape == (HK,)
    assert w_k.shape == (C, HK) and w_v.shape == (C, HK)

    out_dtype = hidden_states_q.dtype
    cd = compute_dtype

    tb = min(batch_tile, B)
    assert B % tb == 0, "batch tile must divide batch"

    # --- boundary casts & weight prep (halves HBM->VMEM traffic vs in-kernel casts)
    hq = hidden_states_q.astype(cd)
    kvc = compressed_kv.astype(cd)
    wq = w_q.astype(cd)
    bq = b_q.reshape(1, HK).astype(jnp.float32)                # added to f32 accumulator
    w_kv = jnp.concatenate([w_k, w_v], axis=1).astype(cd)      # (C, 2*HK) fused [k|v]
    seg_mat, expand_mat = _segment_matrices(num_heads, head_dim, cd)

    kernel = functools.partial(_mla_attn_kernel, num_heads=num_heads,
                               head_dim=head_dim, compute_dtype=cd)

    const = lambda b: (0, 0)   # weights / bias / selectors: same block every step

    return pl.pallas_call(
        kernel,
        out_shape=jax.ShapeDtypeStruct((B, HK), out_dtype),
        grid_spec=pltpu.PrefetchScalarGridSpec(
            num_scalar_prefetch=0,
            grid=(B // tb,),
            in_specs=[
                pl.BlockSpec((tb, D), lambda b: (b, 0)),          # hidden_states_q
                pl.BlockSpec((tb, L, C), lambda b: (b, 0, 0)),    # compressed_kv (no HBM transpose)
                pl.BlockSpec((D, HK), const),                     # q_proj weight
                pl.BlockSpec((1, HK), const),                     # q_proj bias (f32)
                pl.BlockSpec((C, 2 * HK), const),                 # fused [k|v] projection weight
                pl.BlockSpec((HK, num_heads), const),             # per-head reduce selector
                pl.BlockSpec((num_heads, HK), const),             # per-head expand selector
            ],
            out_specs=pl.BlockSpec((tb, HK), lambda b: (b, 0)),   # lane-dense (HK) output
        ),
        compiler_params=pltpu.CompilerParams(
            dimension_semantics=("parallel",),
            vmem_limit_bytes=_default_vmem_limit(),
        ),
    )(hq, kvc, wq, bq, w_kv, seg_mat, expand_mat)


def _reference(hidden_states_q, compressed_kv, w_q, b_q, w_k, w_v, *, num_heads, head_dim):
    """Pure-JAX f32 reference mirroring the PyTorch forward exactly."""
    B = hidden_states_q.shape[0]
    L = compressed_kv.shape[1]
    H, K = num_heads, head_dim
    q = (hidden_states_q @ w_q + b_q).reshape(B, H, K)                      # [B,H,K]
    k = (compressed_kv @ w_k).reshape(B, L, H, K).transpose(0, 2, 1, 3)     # [B,H,L,K]
    v = (compressed_kv @ w_v).reshape(B, L, H, K).transpose(0, 2, 1, 3)     # [B,H,L,K]
    scores = jnp.einsum('bhk,bhlk->bhl', q, k)                              # [B,H,L]  (no scaling)
    probs = jax.nn.softmax(scores, axis=-1)
    out = jnp.einsum('bhl,bhlk->bhk', probs, v)                             # [B,H,K]
    return out.reshape(B, H * K)


if __name__ == "__main__":
    # Small shapes consistent with the module's forward.
    B = 2    # batch
    L = 8    # compressed KV sequence length
    H = 4    # num_heads
    K = 32   # head_dim  -> H*K = 128 (lane friendly)
    C = 64   # lora_rank
    D = 32   # q_lora_rank
    dtype = jnp.float32

    key = jax.random.PRNGKey(0)
    k_hq, k_kv, k_wq, k_bq, k_wk, k_wv = jax.random.split(key, 6)

    hidden_states_q = jax.random.normal(k_hq, (B, D), dtype=dtype)
    compressed_kv = jax.random.normal(k_kv, (B, L, C), dtype=dtype)

    # torch.nn.Linear-style init; weights stored transposed as [in, out].
    q_bound = 1.0 / (D ** 0.5)
    kv_bound = 1.0 / (C ** 0.5)
    w_q = jax.random.uniform(k_wq, (D, H * K), dtype=dtype, minval=-q_bound, maxval=q_bound)
    b_q = jax.random.uniform(k_bq, (H * K,), dtype=dtype, minval=-q_bound, maxval=q_bound)
    w_k = jax.random.uniform(k_wk, (C, H * K), dtype=dtype, minval=-kv_bound, maxval=kv_bound)
    w_v = jax.random.uniform(k_wv, (C, H * K), dtype=dtype, minval=-kv_bound, maxval=kv_bound)

    out = simple_compressed_attention(hidden_states_q, compressed_kv, w_q, b_q, w_k, w_v,
                                      num_heads=H, head_dim=K)
    out = jax.block_until_ready(out)

    ref = _reference(hidden_states_q, compressed_kv, w_q, b_q, w_k, w_v,
                     num_heads=H, head_dim=K)
    assert out.shape == (B, H * K)
    # bf16 MXU inputs + approx EUP reciprocal (f32 accumulation throughout) vs an
    # f32 reference: scores are O(+-4), so worst-case per-element error is a few e-2.
    assert jnp.allclose(out, ref, atol=5e-2, rtol=5e-2), "mismatch vs reference"

    print("KERNEL_OK")
</pallas_src>

<mosaic_0001>
module attributes {stable_mosaic.version = 11 : i64} {
  func.func @_mla_attn_kernel(%arg0: i32, %arg1: memref<2x32xbf16, #tpu.memory_space<vmem>>, %arg2: memref<2x8x64xbf16, #tpu.memory_space<vmem>>, %arg3: memref<32x128xbf16, #tpu.memory_space<vmem>>, %arg4: memref<1x128xf32, #tpu.memory_space<vmem>>, %arg5: memref<64x256xbf16, #tpu.memory_space<vmem>>, %arg6: memref<128x4xbf16, #tpu.memory_space<vmem>>, %arg7: memref<4x128xbf16, #tpu.memory_space<vmem>>, %arg8: memref<2x128xf32, #tpu.memory_space<vmem>>) attributes {dimension_semantics = [#tpu.dimension_semantics<parallel>], iteration_bounds = array<i64: 1>, scalar_prefetch = 0 : i64, scratch_operands = 0 : i64, tpu.core_type = #tpu.core_type<tc>, window_params = [{transform_indices = @transform_0, window_bounds = array<i64: 2, 32>}, {transform_indices = @transform_1, window_bounds = array<i64: 2, 8, 64>}, {pipeline_mode = #tpu.pipeline_mode<synchronous>, transform_indices = @transform_2, window_bounds = array<i64: 32, 128>}, {pipeline_mode = #tpu.pipeline_mode<synchronous>, transform_indices = @transform_3, window_bounds = array<i64: 1, 128>}, {pipeline_mode = #tpu.pipeline_mode<synchronous>, transform_indices = @transform_4, window_bounds = array<i64: 64, 256>}, {pipeline_mode = #tpu.pipeline_mode<synchronous>, transform_indices = @transform_5, window_bounds = array<i64: 128, 4>}, {pipeline_mode = #tpu.pipeline_mode<synchronous>, transform_indices = @transform_6, window_bounds = array<i64: 4, 128>}, {transform_indices = @transform_7, window_bounds = array<i64: 2, 128>}]} {
    %c0 = arith.constant 0 : index
    %c0_0 = arith.constant 0 : index
    %0 = vector.load %arg1[%c0, %c0_0] : memref<2x32xbf16, #tpu.memory_space<vmem>>, vector<2x32xbf16>
    %c0_1 = arith.constant 0 : index
    %c0_2 = arith.constant 0 : index
    %1 = vector.load %arg3[%c0_1, %c0_2] : memref<32x128xbf16, #tpu.memory_space<vmem>>, vector<32x128xbf16>
    %cst = arith.constant dense<0.000000e+00> : vector<2x128xf32>
    %2 = tpu.matmul %0, %1, %cst {dimension_numbers = #tpu.dot_dimension_numbers<[1], [0], [0], [1], [0, 0, 1, 1], [], []>} : vector<2x32xbf16>, vector<32x128xbf16>, vector<2x128xf32> -> vector<2x128xf32>
    %c0_3 = arith.constant 0 : index
    %c0_4 = arith.constant 0 : index
    %3 = vector.load %arg4[%c0_3, %c0_4] : memref<1x128xf32, #tpu.memory_space<vmem>>, vector<1x128xf32>
    %4 = vector.broadcast %3 : vector<1x128xf32> to vector<2x128xf32>
    %5 = arith.addf %2, %4 : vector<2x128xf32>
    %c0_5 = arith.constant 0 : index
    %c0_6 = arith.constant 0 : index
    %c0_7 = arith.constant 0 : index
    %6 = vector.load %arg2[%c0_5, %c0_6, %c0_7] : memref<2x8x64xbf16, #tpu.memory_space<vmem>>, vector<2x8x64xbf16>
    %7 = vector.shape_cast %6 : vector<2x8x64xbf16> to vector<16x64xbf16>
    %c0_8 = arith.constant 0 : index
    %c0_9 = arith.constant 0 : index
    %8 = vector.load %arg5[%c0_8, %c0_9] : memref<64x256xbf16, #tpu.memory_space<vmem>>, vector<64x256xbf16>
    %cst_10 = arith.constant dense<0.000000e+00> : vector<16x256xf32>
    %9 = tpu.matmul %7, %8, %cst_10 {dimension_numbers = #tpu.dot_dimension_numbers<[1], [0], [0], [1], [0, 0, 1, 1], [], []>} : vector<16x64xbf16>, vector<64x256xbf16>, vector<16x256xf32> -> vector<16x256xf32>
    %10 = vector.extract_strided_slice %9 {offsets = [0, 0], sizes = [16, 128], strides = [1, 1]} : vector<16x256xf32> to vector<16x128xf32>
    %11 = vector.extract_strided_slice %9 {offsets = [0, 128], sizes = [16, 128], strides = [1, 1]} : vector<16x256xf32> to vector<16x128xf32>
    %12 = vector.shape_cast %5 : vector<2x128xf32> to vector<2x1x128xf32>
    %13 = vector.shape_cast %10 : vector<16x128xf32> to vector<2x8x128xf32>
    %14 = vector.broadcast %12 : vector<2x1x128xf32> to vector<2x8x128xf32>
    %15 = arith.mulf %14, %13 : vector<2x8x128xf32>
    %16 = vector.shape_cast %15 : vector<2x8x128xf32> to vector<16x128xf32>
    %17 = arith.truncf %16 : vector<16x128xf32> to vector<16x128xbf16>
    %c0_11 = arith.constant 0 : index
    %c0_12 = arith.constant 0 : index
    %18 = vector.load %arg6[%c0_11, %c0_12] : memref<128x4xbf16, #tpu.memory_space<vmem>>, vector<128x4xbf16>
    %cst_13 = arith.constant dense<0.000000e+00> : vector<16x4xf32>
    %19 = tpu.matmul %17, %18, %cst_13 {dimension_numbers = #tpu.dot_dimension_numbers<[1], [0], [0], [1], [0, 0, 1, 1], [], []>} : vector<16x128xbf16>, vector<128x4xbf16>, vector<16x4xf32> -> vector<16x4xf32>
    %20 = vector.shape_cast %19 : vector<16x4xf32> to vector<2x8x4xf32>
    %cst_14 = arith.constant dense<0xFF800000> : vector<2x4xf32>
    %21 = vector.multi_reduction <maximumf>, %20, %cst_14 [1] : vector<2x8x4xf32> to vector<2x4xf32>
    %22 = vector.shape_cast %21 : vector<2x4xf32> to vector<2x1x4xf32>
    %23 = vector.broadcast %22 : vector<2x1x4xf32> to vector<2x8x4xf32>
    %24 = arith.subf %20, %23 : vector<2x8x4xf32>
    %25 = math.exp %24 : vector<2x8x4xf32>
    %cst_15 = arith.constant dense<0.000000e+00> : vector<2x4xf32>
    %26 = vector.multi_reduction <add>, %25, %cst_15 [1] : vector<2x8x4xf32> to vector<2x4xf32>
    %27 = tpu.reciprocal %26 {approx = true} : vector<2x4xf32> -> vector<2x4xf32>
    %28 = vector.shape_cast %27 : vector<2x4xf32> to vector<2x1x4xf32>
    %29 = vector.broadcast %28 : vector<2x1x4xf32> to vector<2x8x4xf32>
    %30 = arith.mulf %25, %29 : vector<2x8x4xf32>
    %31 = vector.shape_cast %30 : vector<2x8x4xf32> to vector<16x4xf32>
    %32 = arith.truncf %31 : vector<16x4xf32> to vector<16x4xbf16>
    %c0_16 = arith.constant 0 : index
    %c0_17 = arith.constant 0 : index
    %33 = vector.load %arg7[%c0_16, %c0_17] : memref<4x128xbf16, #tpu.memory_space<vmem>>, vector<4x128xbf16>
    %cst_18 = arith.constant dense<0.000000e+00> : vector<16x128xf32>
    %34 = tpu.matmul %32, %33, %cst_18 {dimension_numbers = #tpu.dot_dimension_numbers<[1], [0], [0], [1], [0, 0, 1, 1], [], []>} : vector<16x4xbf16>, vector<4x128xbf16>, vector<16x128xf32> -> vector<16x128xf32>
    %35 = arith.mulf %34, %11 : vector<16x128xf32>
    %36 = vector.shape_cast %35 : vector<16x128xf32> to vector<2x8x128xf32>
    %cst_19 = arith.constant dense<0.000000e+00> : vector<2x128xf32>
    %37 = vector.multi_reduction <add>, %36, %cst_19 [1] : vector<2x8x128xf32> to vector<2x128xf32>
    %c0_20 = arith.constant 0 : index
    %c0_21 = arith.constant 0 : index
    %38 = vector.load %arg8[%c0_20, %c0_21] : memref<2x128xf32, #tpu.memory_space<vmem>>, vector<2x128xf32>
    tpu.vector_store %arg8[%c0_20, %c0_21], %37 {strides = array<i32>} : memref<2x128xf32, #tpu.memory_space<vmem>>, vector<2x128xf32>,
    return
  }
  func.func @transform_0(%arg0: i32) -> (i32, i32) {
    %c0_i32 = arith.constant 0 : i32
    %c0_i32_0 = arith.constant 0 : i32
    return %arg0, %c0_i32 : i32, i32
  }
  func.func @transform_1(%arg0: i32) -> (i32, i32, i32) {
    %c0_i32 = arith.constant 0 : i32
    %c0_i32_0 = arith.constant 0 : i32
    %c0_i32_1 = arith.constant 0 : i32
    return %arg0, %c0_i32, %c0_i32_0 : i32, i32, i32
  }
  func.func @transform_2(%arg0: i32) -> (i32, i32) {
    %c0_i32 = arith.constant 0 : i32
    %c0_i32_0 = arith.constant 0 : i32
    %c0_i32_1 = arith.constant 0 : i32
    return %c0_i32, %c0_i32_0 : i32, i32
  }
  func.func @transform_3(%arg0: i32) -> (i32, i32) {
    %c0_i32 = arith.constant 0 : i32
    %c0_i32_0 = arith.constant 0 : i32
    %c0_i32_1 = arith.constant 0 : i32
    return %c0_i32, %c0_i32_0 : i32, i32
  }
  func.func @transform_4(%arg0: i32) -> (i32, i32) {
    %c0_i32 = arith.constant 0 : i32
    %c0_i32_0 = arith.constant 0 : i32
    %c0_i32_1 = arith.constant 0 : i32
    return %c0_i32, %c0_i32_0 : i32, i32
  }
  func.func @transform_5(%arg0: i32) -> (i32, i32) {
    %c0_i32 = arith.constant 0 : i32
    %c0_i32_0 = arith.constant 0 : i32
    %c0_i32_1 = arith.constant 0 : i32
    return %c0_i32, %c0_i32_0 : i32, i32
  }
  func.func @transform_6(%arg0: i32) -> (i32, i32) {
    %c0_i32 = arith.constant 0 : i32
    %c0_i32_0 = arith.constant 0 : i32
    %c0_i32_1 = arith.constant 0 : i32
    return %c0_i32, %c0_i32_0 : i32, i32
  }
  func.func @transform_7(%arg0: i32) -> (i32, i32) {
    %c0_i32 = arith.constant 0 : i32
    %c0_i32_0 = arith.constant 0 : i32
    return %arg0, %c0_i32 : i32, i32
  }
}

</mosaic_0001>

<bundles_post_ra>
// kernel: tpu_custom_call.1
= control target key start
LH: loop header
LB: loop body
LE: loop exit
PB: predicated region body
PF: predicated region fallthrough
CT: control target
= control target key end

     0   :  { %12 = vsyncpa [#allocation3], 0  ;;  %s744_s0 = inlined_call_operand.vmem [shape: bf16[2,32], index: 0, kind: input, shape index: {}]   ;;  %s745_s1 = inlined_call_operand.hbm [shape: bf16[2,8,64], index: 1, kind: input, shape index: {}]   ;;  %s746_s2 = inlined_call_operand.hbm [shape: bf16[32,128], index: 2, kind: input, shape index: {}]   ;;  %s747_s3 = inlined_call_operand.hbm [shape: f32[1,128], index: 3, kind: input, shape index: {}]   ;;  %s748_s4 = inlined_call_operand.vmem [shape: bf16[64,256], index: 4, kind: input, shape index: {}]   ;;  %s749_s5 = inlined_call_operand.vmem [shape: bf16[128,4], index: 5, kind: input, shape index: {}]   ;;  %s750_s6 = inlined_call_operand.vmem [shape: bf16[4,128], index: 6, kind: input, shape index: {}]   ;;  %s751_s7 = inlined_call_operand.hbm [shape: f32[2,128], index: 7, kind: output, shape index: {}]  }
   0x1   :  { %13 = vsyncpa [#allocation6], 0 }
   0x2   :  { %14 = vsyncpa [#allocation4], 0  ;;  %s34_s26 = sshll.u32 %s746_s2, 4  ;;  %s601_s27 = smov [#allocation5]   ;;  %s35_s26 = int_to_ptr.hbm [resolvable:$true] %s34_s26 }
   0x3   :  { %s36_s28 = sshll.u32 %s601_s27, 4  ;;  %s21_s8 = sshll.u32 %s745_s1, 4  ;;  %s37_s28 = int_to_ptr.vmem [resolvable:$true] %s36_s28  ;;  %s22_s8 = int_to_ptr.hbm [resolvable:$true] %s21_s8 }
   0x4   :  { %s602_s9 = smov 64   ;;  %s603_s10 = smov 4  }
   0x5   :  { %42 = dma.hbm_to_vmem [thread:$0]  %s35_s26, 256, %s37_s28, [#allocation6], %s602_s9, %s602_s9, %s603_s10  }
   0x6   :  { %s604_s11 = smov [#allocation2]   ;;  %s48_s15 = sshll.u32 %s747_s3, 4  ;;  %s49_s15 = int_to_ptr.hbm [resolvable:$true] %s48_s15 }
   0x7   :  { %s23_s12 = sshll.u32 %s604_s11, 4  ;;  %s605_s2 = smov [#allocation7]   ;;  %s24_s12 = int_to_ptr.vmem [resolvable:$true] %s23_s12 }
   0x8   :  { %29 = dma.hbm_to_vmem [thread:$0]  %s22_s8, 128, %s24_s12, [#allocation3], %s602_s9, %s602_s9, %s603_s10  }
   0x9   :  { %s50_s16 = sshll.u32 %s605_s2, 4  ;;  %s51_s16 = int_to_ptr.vmem [resolvable:$true] %s50_s16 }
   0xa   :  { %53 = dma.hbm_to_vmem [thread:$0]  %s49_s15, 16, %s51_s16, [#allocation6]  }
   0xb   :  { %595 = dma.done.wait [#allocation3], 128  }
   0xc   :  { %596 = vsyncadd [#allocation3], 4294967168 }
   0xd   :  { %597 = dma.done.wait [#allocation6], 272  }
   0xe   :  { %598 = vsyncadd [#allocation6], 4294967024  ;;  %v424_v0 = vld [vmem:[%s748_s4 + $0x30] sm:$0xf]  ;;  %v475_v1 = vld [vmem:[%s748_s4 + $0x34] sm:$0xf0] }
   0xf   :  { %v466_v2 = vld [vmem:[#allocation5 + $0x8] sm:$0xff]  ;;  %v425_v3 = vor.u32 %v475_v1, %v424_v0  ;;  %v416_v4 = vld [vmem:[%s748_s4 + $0x20] sm:$0xf]  ;;  %v473_v5 = vld [vmem:[%s748_s4 + $0x24] sm:$0xf0]  ;;  %vm94_vm0 = vcmask 261120  }
  0x10   :  { %104 = vmatpush.bf16.msra.mxu0 %v466_v2  ;;  %v465_v6 = vld [vmem:[#allocation5] sm:$0xff]  ;;  %v417_v7 = vor.u32 %v473_v5, %v416_v4  ;;  %v408_v8 = vld [vmem:[%s748_s4 + $0x10] sm:$0xf]  ;;  %v471_v9 = vld [vmem:[%s748_s4 + $0x14] sm:$0xf0]  ;;  %vm166_vm1 = vcmask 523264  }
  0x11   :  { %174 = vmatpush.bf16.msra.mxu1 %v425_v3  ;;  %v483_v10 = vld [vmem:[%s749_s5 + $0x38] sm:$0xff]  ;;  %v73_v11 = vld [vmem:[%s744_s0] sm:$0x1]  ;;  %v482_v12 = vld [vmem:[%s749_s5 + $0x30] sm:$0xff]  ;;  %v409_v13 = vor.u32 %v471_v9, %v408_v8  ;;  %vm285_vm2 = vcmask 31744   ;;  %vm329_vm3 = vcmask 1041408  }
  0x12   :  { %271 = vmatpush.bf16.msra.mxu3 %v483_v10  ;;  %v400_v14 = vld [vmem:[%s748_s4] sm:$0xf]  ;;  %v469_v15 = vld [vmem:[%s748_s4 + $0x4] sm:$0xf0]  ;;  %v479_v20 = vld [vmem:[%s749_s5 + $0x18] sm:$0xff]  ;;  %s374_s16 = sshll.u32 %s751_s7, 4  ;;  %s375_s16 = int_to_ptr.hbm [resolvable:$true] %s374_s16 }
  0x13   :  { %v481_v16 = vld [vmem:[%s749_s5 + $0x28] sm:$0xff]  ;;  %v401_v17 = vor.u32 %v469_v15, %v400_v14  ;;  %v467_v18 = vld [vmem:[#allocation2] sm:$0xff]  ;;  %v478_v21 = vld [vmem:[%s749_s5 + $0x10] sm:$0xff]  ;;  %vm363_vm4 = vcmask 1041409  }
  0x14   :  { %105 = vmatpush.bf16.msra.mxu0 %v465_v6  ;;  %v480_v19 = vld [vmem:[%s749_s5 + $0x20] sm:$0xff]  ;;  %v477_v22 = vld [vmem:[%s749_s5 + $0x8] sm:$0xff]  ;;  %v490_v25 = vld [vmem:[#allocation7] ss:$0 sm:$0xff] }
  0x15   :  { %175 = vmatpush.bf16.msra.mxu1 %v417_v7  ;;  %v476_v23 = vld [vmem:[%s749_s5] sm:$0xff]  ;;  %v474_v36 = vld [vmem:[%s748_s4 + $0x34] sm:$0xf]  ;;  %v426_v37 = vld [vmem:[%s748_s4 + $0x38] sm:$0xf0] }
  0x16   :  { %272 = vmatpush.bf16.msra.mxu3 %v482_v12  ;;  %v429_v38 = vor.u32 %v474_v36, %v426_v37  ;;  %v472_v39 = vld [vmem:[%s748_s4 + $0x24] sm:$0xf]  ;;  %v418_v40 = vld [vmem:[%s748_s4 + $0x28] sm:$0xf0]  ;;  %v470_v44 = vld [vmem:[%s748_s4 + $0x14] sm:$0xf] }
  0x17   :  { %393 = vmatmul.msk.bf16.vlgmr.msra.gmra.mxu0 %vm94_vm0, %v73_v11  ;;  %v421_v41 = vor.u32 %v472_v39, %v418_v40  ;;  %v410_v45 = vld [vmem:[%s748_s4 + $0x18] sm:$0xf0]  ;;  %v468_v49 = vld [vmem:[%s748_s4 + $0x4] sm:$0xf]  ;;  %v402_v50 = vld [vmem:[%s748_s4 + $0x8] sm:$0xf0] }
  0x18   :  { %188 = vmatpush.bf16.msra.mxu2 %v429_v38  ;;  %v413_v47 = vor.u32 %v470_v44, %v410_v45  ;;  %v405_v52 = vor.u32 %v468_v49, %v402_v50  ;;  %v325_v2 = vld [vmem:[%s750_s6] sm:$0x3]  ;;  %s606_s6 = smov [#allocation8]  }
  0x19   :  { %176 = vmatpush.bf16.msra.mxu1 %v409_v13  ;;  %v331_v3 = vsel %vm329_vm3, %v325_v2, 0  ;;  %s372_s0 = sshll.u32 %s606_s6, 4  ;;  %s373_s0 = int_to_ptr.vmem [resolvable:$true] %s372_s0 }
  0x1a   :  { %273 = vmatpush.bf16.msra.mxu3 %v481_v16  ;;  %340 = vmatpush.bf16.msrb.mxu0 %v331_v3 }
  0x1c   :  { %189 = vmatpush.bf16.msra.mxu2 %v421_v41 }
  0x1d   :  { %177 = vmatpush.bf16.msra.mxu1 %v401_v17 }
  0x1e   :  { %274 = vmatpush.bf16.msra.mxu3 %v480_v19 }
  0x20   :  { %430 = vmatmul.msk.bf16.vlgmr.msra.gmra.mxu1 %vm166_vm1, %v467_v18  ;;  %190 = vmatpush.bf16.msra.mxu2 %v413_v47 }
  0x22   :  { %275 = vmatpush.bf16.msra.mxu3 %v479_v20 }
  0x24   :  { %191 = vmatpush.bf16.msra.mxu2 %v405_v52 }
  0x26   :  { %276 = vmatpush.bf16.msra.mxu3 %v478_v21 }
  0x27   :  { %431 = vmatmul.msk.bf16.vlgmr.msra.gmra.mxu2 %vm166_vm1, %v467_v18 }
  0x2a   :  { %277 = vmatpush.bf16.msra.mxu3 %v477_v22 }
  0x2e   :  { %278 = vmatpush.bf16.msra.mxu3 %v476_v23 }
  0x94   :  { %v107_v24 = vpop.f32.mrf.mxu0 }
  0x95   :  { %v108_v26 = vadd.f32 %v490_v25, %v107_v24 }
  0x97   :  { %v199_v29 = vrot.slane %v108_v26, 1  ;;  %v200_v30 = vperm.slane %v108_v26, 0 }
  0x99   :  { %v201_v31 = vperm.slane %v199_v29, 0 }
  0x9c   :  { %v109_v27 = vpop.f32.mrf.mxu0 }
  0x9d   :  { %v179_v28 = vpop.f32.mrf.mxu1 }
  0x9e   :  { %v204_v33 = vmul.f32 %v200_v30, %v179_v28 }
  0xa5   :  { %v181_v32 = vpop.f32.mrf.mxu1 }
  0xa6   :  { %v205_v34 = vmul.f32 %v201_v31, %v181_v32 }
  0xa8   :  { %v206_v35 = vpack.c.bf16 %v205_v34, %v204_v33 }
  0xaa   :  { %279 = vmatmul.bf16.vlgmr.msra.gmra.mxu3 %v206_v35  ;;  %v193_v27 = vpop.f32.mrf.mxu2 }
  0xb2   :  { %v195_v32 = vpop.f32.mrf.mxu2 }
 0x12d   :  { %v280_v42 = vpop.f32.mrf.mxu3 }
 0x12e   :  { %v286_v43 = vsel %vm285_vm2, %v280_v42, -inf }
 0x12f   :  { %v287_v46 = vrot.slane %v286_v43, 4 }
 0x131   :  { %v288_v48 = vmax.f32 %v286_v43, %v287_v46 }
 0x133   :  { %v289_v51 = vrot.slane %v288_v48, 2 }
 0x135   :  { %v290_v53 = vmax.f32 %v288_v48, %v289_v51  ;;  %v282_v54 = vpop.f32.mrf.mxu3 }
 0x136   :  { %v293_v55 = vsel %vm285_vm2, %v282_v54, -inf }
 0x137   :  { %v291_v56 = vrot.slane %v290_v53, 1  ;;  %v294_v57 = vrot.slane %v293_v55, 4 }
 0x139   :  { %v292_v58 = vmax.f32 %v290_v53, %v291_v56  ;;  %v295_v59 = vmax.f32 %v293_v55, %v294_v57 }
 0x13b   :  { %v300_v60 = vsub.f32 %v280_v42, %v292_v58  ;;  %v296_v61 = vrot.slane %v295_v59, 2 }
 0x13d   :  { %v302_v62 = vmul.f32 1.442695, %v300_v60  ;;  %v297_v63 = vmax.f32 %v295_v59, %v296_v61 }
 0x13f   :  { %491 = vpow2.f32 %v302_v62  ;;  %v298_v0 = vrot.slane %v297_v63, 1 }
 0x141   :  { %v299_v1 = vmax.f32 %v297_v63, %v298_v0 }
 0x143   :  { %v301_v4 = vsub.f32 %v282_v54, %v299_v1 }
 0x145   :  { %v492_v5 = vpop.eup %491  ;;  %v304_v6 = vmul.f32 1.442695, %v301_v4 }
 0x146   :  { %v306_v7 = vsel %vm285_vm2, %v492_v5, 0.0 }
 0x147   :  { %v307_v8 = vrot.slane %v306_v7, 4  ;;  %493 = vpow2.f32 %v304_v6 }
 0x149   :  { %v308_v9 = vadd.f32 %v307_v8, %v306_v7 }
 0x14b   :  { %v309_v10 = vrot.slane %v308_v9, 2 }
 0x14d   :  { %v494_v11 = vpop.eup %493  ;;  %v310_v12 = vadd.f32 %v309_v10, %v308_v9 }
 0x14e   :  { %v313_v13 = vsel %vm285_vm2, %v494_v11, 0.0 }
 0x14f   :  { %v314_v14 = vrot.slane %v313_v13, 4  ;;  %v311_v15 = vrot.slane %v310_v12, 1 }
 0x151   :  { %v315_v16 = vadd.f32 %v314_v14, %v313_v13  ;;  %v312_v18 = vadd.f32 %v311_v15, %v310_v12 }
 0x153   :  { %v316_v17 = vrot.slane %v315_v16, 2  ;;  %495 = vrcp.f32 %v312_v18 }
 0x155   :  { %v317_v19 = vadd.f32 %v316_v17, %v315_v16 }
 0x157   :  { %v318_v20 = vrot.slane %v317_v19, 1 }
 0x159   :  { %v319_v21 = vadd.f32 %v318_v20, %v317_v19  ;;  %v496_v22 = vpop.eup %495 }
 0x15a   :  { %v322_v25 = vmul.f32 %v496_v22, %v492_v5 }
 0x15b   :  { %497 = vrcp.f32 %v319_v21 }
 0x161   :  { %v498_v23 = vpop.eup %497 }
 0x162   :  { %v323_v24 = vmul.f32 %v498_v23, %v494_v11 }
 0x164   :  { %v324_v26 = vpack.c.bf16 %v323_v24, %v322_v25 }
 0x166   :  { %464 = vmatmul.msk.bf16.vlgmr.msrb.gmra.mxu0 %vm285_vm2, %v324_v26 }
 0x1e3   :  { %v342_v28 = vpop.f32.mrf.mxu0 }
 0x1e4   :  { %v347_v29 = vmul.f32 %v342_v28, %v193_v27 }
 0x1e6   :  { %v349_v30 = vrot.slane %v347_v29, 4 }
 0x1e8   :  { %v350_v31 = vadd.f32 %v349_v30, %v347_v29 }
 0x1ea   :  { %v351_v34 = vrot.slane %v350_v31, 2 }
 0x1eb   :  { %v344_v33 = vpop.f32.mrf.mxu0 }
 0x1ec   :  { %v348_v35 = vmul.f32 %v344_v33, %v195_v32  ;;  %v352_v37 = vadd.f32 %v351_v34, %v350_v31 }
 0x1ee   :  { %v355_v36 = vrot.slane %v348_v35, 4  ;;  %v353_v40 = vrot.slane %v352_v37, 1 }
 0x1f0   :  { %v356_v38 = vadd.f32 %v355_v36, %v348_v35  ;;  %v354_v43 = vadd.f32 %v353_v40, %v352_v37 }
 0x1f2   :  { %v357_v39 = vrot.slane %v356_v38, 2 }
 0x1f4   :  { %v358_v41 = vadd.f32 %v357_v39, %v356_v38 }
 0x1f6   :  { %v359_v42 = vrot.slane %v358_v41, 1 }
 0x1f8   :  { %v360_v44 = vadd.f32 %v359_v42, %v358_v41 }
 0x1fa   :  { %v364_v45 = vsel %vm363_vm4, %v360_v44, %v354_v43 }
 0x1fb   :  { %366 = vst [vmem:[#allocation8] sm:$0x3] %v364_v45 }
 0x1fc   :  { %377 = dma.vmem_to_hbm [thread:$0]  %s373_s0, 32, %s375_s16, [#allocation4]  }
 0x1fd   :  { %599 = dma.done.wait [#allocation4], 32  }
 0x1fe   :  { %600 = vsyncadd [#allocation4], 4294967264 }
 0x1ff   :  { %382 = vsyncpa [#allocation3], 1 }
 0x200   :  { %383 = vsyncpa [#allocation6], 1 }
 0x201   :  { %384 = vsyncpa [#allocation4], 1 }

</bundles_post_ra>
